<compile_context>
chip_gen: v6e
topology: v6e:2x2x1
jax: 0.10.0
libtpu: 0.0.40
codegen_flags: <defaults>
</compile_context>

<pallas_src>
import functools

import numpy as np

import jax
import jax.numpy as jnp
from jax.experimental import pallas as pl
from jax.experimental.pallas import tpu as pltpu

BN_EPS = 1e-5
LANES = 128


def _round_up(x, m):
    return ((x + m - 1) // m) * m


def _upsample_matrix_x2_align_corners(l_in):
    """Static interp matrix U (2*l_in, l_in): out = U @ in  ==  nn.Upsample(2x, linear, align_corners=True)."""
    l_out = 2 * l_in
    pos = np.arange(l_out, dtype=np.float64) * (l_in - 1) / (l_out - 1)
    i0 = np.clip(np.floor(pos).astype(np.int64), 0, l_in - 1)
    i1 = np.clip(i0 + 1, 0, l_in - 1)
    frac = pos - i0
    U = np.zeros((l_out, l_in), np.float32)
    rows = np.arange(l_out)
    U[rows, i0] += (1.0 - frac).astype(np.float32)
    U[rows, i1] += frac.astype(np.float32)
    return jnp.asarray(U)


def _up_double_conv_kernel(x_ref, w1_ref, w2_ref, bn_ref, out_ref, *, seg_len):
    """Fused DoubleConv on x = concat([x2, up(x1)], channels).

    x_ref : (N*L, Cin)     real (unpadded) channels of the concat; rows = flat (batch, length)
    w1_ref: (3*Cin, mid)   conv1 weights, im2col row order [tap l-1 | tap l | tap l+1]
    w2_ref: (3*mid, Cout_p) conv2 weights, output channels zero-padded to a lane multiple
    bn_ref: (4, bn_w)      rows = [gamma1, beta1, gamma2, beta2] (zero-padded lanes)
    out_ref: (N*L, Cout_p) lane-dense output slab; real channels in [:, :cout]
    """
    rows = x_ref.shape[0]
    mid = w1_ref.shape[1]
    cout_p = w2_ref.shape[1]
    inv_rows = 1.0 / rows
    ones_row = jnp.ones((1, rows), jnp.float32)

    # Per-row position inside its sample: masks the k=3 conv halo at sample edges so
    # the row shift never leaks across samples (or wraps around the flat array).
    row = jax.lax.broadcasted_iota(jnp.int32, (rows, 1), 0)
    l_idx = row % seg_len
    is_first = l_idx == 0               # zero-pad on the left of each sample
    is_last = l_idx == seg_len - 1      # zero-pad on the right of each sample

    def im2col(h):
        # Static-shift jnp.roll (sublane slice+concat) + edge masks; all three taps
        # packed into one narrow lane group so each conv is a single MXU matmul.
        h_prev = jnp.where(is_first, 0.0, jnp.roll(h, 1, axis=0))
        h_next = jnp.where(is_last, 0.0, jnp.roll(h, -1, axis=0))
        return jnp.concatenate([h_prev, h, h_next], axis=-1)   # (rows, 3*C)

    def bn_relu(y, gamma, beta):
        # Training-mode BatchNorm1d (biased batch stats over N*L) folded into a single
        # per-channel scale/shift.  Reductions run on the MXU (ones-row matmul) instead
        # of sublane reductions.  Conv biases cancel against the batch mean and were
        # dropped host-side.
        mean = jnp.dot(ones_row, y, preferred_element_type=jnp.float32) * inv_rows
        mean_sq = jnp.dot(ones_row, y * y, preferred_element_type=jnp.float32) * inv_rows
        var = jnp.maximum(mean_sq - mean * mean, 0.0)   # guard fp cancellation
        scale = gamma * jax.lax.rsqrt(var + BN_EPS)
        shift = beta - mean * scale
        return jnp.maximum(y * scale + shift, 0.0)

    bn = bn_ref[...]
    x = x_ref[...].astype(jnp.float32)

    # conv1 over the (virtual) channel concat: single small-K matmul.
    y1 = jnp.dot(im2col(x), w1_ref[...], preferred_element_type=jnp.float32)
    h = bn_relu(y1, bn[0:1, :mid], bn[1:2, :mid])

    y2 = jnp.dot(im2col(h), w2_ref[...], preferred_element_type=jnp.float32)
    out_ref[...] = bn_relu(y2, bn[2:3, :cout_p], bn[3:4, :cout_p]).astype(out_ref.dtype)


def init_up_params(key, in_channels, out_channels):
    """Deterministic params matching DoubleConv(in_channels, out_channels, in_channels//2)."""
    mid = in_channels // 2
    k1, k2, k3, k4 = jax.random.split(key, 4)

    def conv_init(kw, kb, cin, cout):
        bound = 1.0 / (cin * 3) ** 0.5  # PyTorch Conv1d default init bound
        w_torch = jax.random.uniform(kw, (cout, cin, 3), jnp.float32, -bound, bound)
        b = jax.random.uniform(kb, (cout,), jnp.float32, -bound, bound)
        # kernel layout: (K, Cin, Cout); tap 0 -> x[l-1], 1 -> x[l], 2 -> x[l+1]
        return jnp.transpose(w_torch, (2, 1, 0)), b.reshape(1, cout)

    w1, b1 = conv_init(k1, k2, in_channels, mid)
    w2, b2 = conv_init(k3, k4, mid, out_channels)
    return dict(
        w1=w1, b1=b1,   # b1/b2 kept for module fidelity; they cancel under training-mode BN
        g1=jnp.ones((1, mid), jnp.float32), be1=jnp.zeros((1, mid), jnp.float32),
        w2=w2, b2=b2,
        g2=jnp.ones((1, out_channels), jnp.float32),
        be2=jnp.zeros((1, out_channels), jnp.float32),
    )


def prepare_kernel_params(params, *, c_skip, c_up):
    """One-time host-side repack:
      * conv1 weights restricted to the REAL channels of [x2, up(x1)] (the F.pad
        channel zero-padding folds away) and stacked in im2col (3*Cin, mid) layout,
      * conv biases dropped (training-mode BN subtracts the batch mean -> exact cancel),
      * conv2 output channels lane-padded so kernel stores are unmasked,
      * the four BN affine vectors stacked into one (4, bn_w) table (1 DMA)."""
    w1, w2 = params["w1"], params["w2"]            # (3, Cin, Cout) layouts
    mid, cout = w1.shape[2], w2.shape[2]
    diff_y = c_skip - c_up                         # PyTorch channel-pads x1 by this before concat
    dy0 = diff_y // 2
    # TODO(synk): negative diff_y (channel cropping) is not handled; module assumes padding.
    w1a = w1[:, :c_skip, :]                                 # taps applied to x2 (skip path)
    w1b = w1[:, c_skip + dy0: c_skip + dy0 + c_up, :]       # taps applied to upsampled x1
    w1_eff = jnp.concatenate([w1a, w1b], axis=1)            # (3, c_skip + c_up, mid)

    cout_p = _round_up(cout, LANES)
    bn_w = _round_up(max(mid, cout), LANES)

    def bn_row(v):
        v = v.reshape(1, -1)
        return jnp.pad(v, ((0, 0), (0, bn_w - v.shape[-1])))

    return dict(
        w1=w1_eff.reshape(3 * (c_skip + c_up), mid),
        w2=jnp.pad(w2.reshape(3 * mid, cout), ((0, 0), (0, cout_p - cout))),
        bn=jnp.concatenate([bn_row(params["g1"]), bn_row(params["be1"]),
                            bn_row(params["g2"]), bn_row(params["be2"])], axis=0),
    )


_PHYS_VMEM_BYTES = None


def _phys_vmem_bytes():
    """Physical VMEM of the attached TPU (fallback: the smallest per-core VMEM, v7x)."""
    global _PHYS_VMEM_BYTES
    if _PHYS_VMEM_BYTES is None:
        try:
            _PHYS_VMEM_BYTES = int(pltpu.get_tpu_info().vmem_capacity_bytes)
        except Exception:
            _PHYS_VMEM_BYTES = 64 * 2 ** 20
    return _PHYS_VMEM_BYTES


@functools.partial(jax.jit, static_argnames=("out_channels",))
def up_forward(x1, x2, kparams, *, out_channels):
    """Up.forward(x1, x2). x1: (N, C1, L1), x2: (N, C2, L2), NCL layout; returns NCL."""
    n, c_up, l1 = x1.shape
    _, c_skip, l2 = x2.shape
    l1u = 2 * l1

    # 2x linear align_corners upsample as a static interp-matrix matmul, fused with the
    # NCL -> NLC layout change (no gathers, no extra transpose for x1).
    U = _upsample_matrix_x2_align_corners(l1)             # constant (l1u, l1)
    x1u = jnp.einsum("ol,ncl->noc", U, x1)                # (n, l1u, c_up)

    diff_x = l2 - l1u
    # TODO(synk): negative diff_x (length cropping) is not handled; module assumes padding.
    x1p = jnp.pad(x1u, ((0, 0), (diff_x // 2, diff_x - diff_x // 2), (0, 0)))

    x2_nlc = jnp.transpose(x2, (0, 2, 1))                 # (n, l2, c_skip)

    # Channel concat [x2, up(x1)] with only the REAL channels (the F.pad channel zeros
    # were folded into the conv1 weight slice host-side).
    cin = c_skip + c_up
    x_cat = jnp.concatenate([x2_nlc, x1p], axis=-1).reshape(n * l2, cin)
    # TODO(synk): upsample/pad/transpose are still wrapper-side XLA ops; at real U-Net
    # sizes fold them into the kernel (and feed bf16 on v6e/v7x) to cut HBM passes.

    rows = n * l2
    assert kparams["w1"].shape[0] == 3 * cin, "kernel params / input channels mismatch"
    mid = kparams["w1"].shape[1]
    cout_p = kparams["w2"].shape[1]

    # VMEM budget from the actual buffers (activations + im2col slabs + weights), 2x
    # slack, capped per-generation at ~85% of physical VMEM (64 MiB v7x, 128 MiB v5e/v6e).
    act_elems = rows * (6 * cin + 6 * mid + 2 * cout_p)
    w_elems = 3 * cin * mid + 3 * mid * cout_p + 4 * kparams["bn"].shape[1]
    vmem_est = 4 * (act_elems + w_elems)
    vmem_limit = int(max(32 * 2 ** 20,
                         min(2 * vmem_est, int(0.85 * _phys_vmem_bytes()))))

    # TODO(synk): for activations that exceed VMEM, grid the row axis (with conv halos,
    # marked "parallel" for the v7x megacore) and split BN into a sum/sumsq accumulation
    # sweep + normalize sweep; at these sizes one VMEM-resident block (exact one-pass BN,
    # zero intermediate HBM traffic) is faster.
    kernel = functools.partial(_up_double_conv_kernel, seg_len=l2)
    out_flat = pl.pallas_call(
        kernel,
        out_shape=jax.ShapeDtypeStruct((rows, cout_p), jnp.float32),
        in_specs=[pl.BlockSpec(memory_space=pltpu.MemorySpace.VMEM)] * 4,
        out_specs=pl.BlockSpec(memory_space=pltpu.MemorySpace.VMEM),
        compiler_params=pltpu.CompilerParams(vmem_limit_bytes=vmem_limit),
    )(x_cat, kparams["w1"], kparams["w2"], kparams["bn"])

    out = out_flat[:, :out_channels].reshape(n, l2, out_channels)
    return jnp.transpose(out, (0, 2, 1))                  # back to NCL


if __name__ == "__main__":
    in_channels, out_channels = 8, 4            # Up(8, 4, bilinear=True)
    N = 2
    c1 = in_channels // 2                       # channels of the upsampled path x1
    c2 = in_channels - c1                       # channels of the skip connection x2
    L1, L2 = 8, 16                              # after 2x upsample, lengths match

    key = jax.random.PRNGKey(0)
    kx1, kx2, kp = jax.random.split(key, 3)
    x1 = jax.random.normal(kx1, (N, c1, L1), jnp.float32)
    x2 = jax.random.normal(kx2, (N, c2, L2), jnp.float32)

    params = init_up_params(kp, in_channels, out_channels)
    kparams = prepare_kernel_params(params, c_skip=c2, c_up=c1)

    out = up_forward(x1, x2, kparams, out_channels=out_channels)
    out = jax.block_until_ready(out)
    assert out.shape == (N, out_channels, L2), out.shape
    assert bool(jnp.all(jnp.isfinite(out)))
    print("KERNEL_OK")
</pallas_src>

<mosaic_0001>
module attributes {stable_mosaic.version = 11 : i64} {
  func.func @_up_double_conv_kernel(%arg0: memref<32x8xf32, #tpu.memory_space<vmem>>, %arg1: memref<24x4xf32, #tpu.memory_space<vmem>>, %arg2: memref<12x128xf32, #tpu.memory_space<vmem>>, %arg3: memref<4x128xf32, #tpu.memory_space<vmem>>, %arg4: memref<32x128xf32, #tpu.memory_space<vmem>>) attributes {dimension_semantics = [], scalar_prefetch = 0 : i64, scratch_operands = 0 : i64, tpu.core_type = #tpu.core_type<tc>} {
    %cst = arith.constant 1.000000e+00 : f32
    %0 = vector.broadcast %cst : f32 to vector<1x32xf32>
    %1 = tpu.iota {dimensions = array<i32: 0>} : vector<32x1xi32>
    %c16_i32 = arith.constant 16 : i32
    %c0_i32 = arith.constant 0 : i32
    %2 = arith.cmpi eq, %c16_i32, %c0_i32 : i32
    %c1_i32 = arith.constant 1 : i32
    %3 = arith.select %2, %c1_i32, %c16_i32 : i32
    %4 = vector.broadcast %3 : i32 to vector<32x1xi32>
    %5 = arith.remsi %1, %4 : vector<32x1xi32>
    %c0_i32_0 = arith.constant 0 : i32
    %6 = vector.broadcast %c0_i32_0 : i32 to vector<32x1xi32>
    %7 = arith.cmpi ne, %5, %6 : vector<32x1xi32>
    %c0_i32_1 = arith.constant 0 : i32
    %8 = vector.broadcast %c0_i32_1 : i32 to vector<32x1xi32>
    %9 = arith.cmpi slt, %5, %8 : vector<32x1xi32>
    %c0_i32_2 = arith.constant 0 : i32
    %10 = arith.cmpi slt, %3, %c0_i32_2 : i32
    %11 = vector.broadcast %10 : i1 to vector<32x1xi1>
    %12 = vector.broadcast %11 : vector<32x1xi1> to vector<32x1xi1>
    %13 = arith.xori %9, %12 : vector<32x1xi1>
    %14 = arith.andi %13, %7 : vector<32x1xi1>
    %15 = vector.broadcast %3 : i32 to vector<32x1xi32>
    %16 = arith.addi %5, %15 : vector<32x1xi32>
    %17 = arith.select %14, %16, %5 : vector<32x1xi1>, vector<32x1xi32>
    %c0_i32_3 = arith.constant 0 : i32
    %18 = vector.broadcast %c0_i32_3 : i32 to vector<32x1xi32>
    %19 = arith.cmpi eq, %17, %18 : vector<32x1xi32>
    %c15_i32 = arith.constant 15 : i32
    %20 = vector.broadcast %c15_i32 : i32 to vector<32x1xi32>
    %21 = arith.cmpi eq, %17, %20 : vector<32x1xi32>
    %c0 = arith.constant 0 : index
    %c0_4 = arith.constant 0 : index
    %22 = vector.load %arg3[%c0, %c0_4] : memref<4x128xf32, #tpu.memory_space<vmem>>, vector<4x128xf32>
    %c0_5 = arith.constant 0 : index
    %c0_6 = arith.constant 0 : index
    %23 = vector.load %arg0[%c0_5, %c0_6] : memref<32x8xf32, #tpu.memory_space<vmem>>, vector<32x8xf32>
    %24 = vector.extract_strided_slice %23 {offsets = [31, 0], sizes = [1, 8], strides = [1, 1]} : vector<32x8xf32> to vector<1x8xf32>
    %25 = vector.extract_strided_slice %23 {offsets = [0, 0], sizes = [31, 8], strides = [1, 1]} : vector<32x8xf32> to vector<31x8xf32>
    %26 = tpu.concatenate %24, %25 in 0 : vector<1x8xf32>, vector<31x8xf32> -> vector<32x8xf32>
    %cst_7 = arith.constant 0.000000e+00 : f32
    %27 = vector.shape_cast %19 : vector<32x1xi1> to vector<32x1xi1>
    %28 = vector.broadcast %27 : vector<32x1xi1> to vector<32x8xi1>
    %29 = vector.broadcast %cst_7 : f32 to vector<32x8xf32>
    %30 = arith.select %28, %29, %26 : vector<32x8xi1>, vector<32x8xf32>
    %31 = vector.extract_strided_slice %23 {offsets = [1, 0], sizes = [31, 8], strides = [1, 1]} : vector<32x8xf32> to vector<31x8xf32>
    %32 = vector.extract_strided_slice %23 {offsets = [0, 0], sizes = [1, 8], strides = [1, 1]} : vector<32x8xf32> to vector<1x8xf32>
    %33 = tpu.concatenate %31, %32 in 0 : vector<31x8xf32>, vector<1x8xf32> -> vector<32x8xf32>
    %cst_8 = arith.constant 0.000000e+00 : f32
    %34 = vector.shape_cast %21 : vector<32x1xi1> to vector<32x1xi1>
    %35 = vector.broadcast %34 : vector<32x1xi1> to vector<32x8xi1>
    %36 = vector.broadcast %cst_8 : f32 to vector<32x8xf32>
    %37 = arith.select %35, %36, %33 : vector<32x8xi1>, vector<32x8xf32>
    %38 = tpu.concatenate %30, %23, %37 in 1 : vector<32x8xf32>, vector<32x8xf32>, vector<32x8xf32> -> vector<32x24xf32>
    %c0_9 = arith.constant 0 : index
    %c0_10 = arith.constant 0 : index
    %39 = vector.load %arg1[%c0_9, %c0_10] : memref<24x4xf32, #tpu.memory_space<vmem>>, vector<24x4xf32>
    %cst_11 = arith.constant dense<0.000000e+00> : vector<32x4xf32>
    %40 = tpu.matmul %38, %39, %cst_11 {dimension_numbers = #tpu.dot_dimension_numbers<[1], [0], [0], [1], [0, 0, 1, 1], [], []>} : vector<32x24xf32>, vector<24x4xf32>, vector<32x4xf32> -> vector<32x4xf32>
    %41 = vector.extract_strided_slice %22 {offsets = [0, 0], sizes = [1, 4], strides = [1, 1]} : vector<4x128xf32> to vector<1x4xf32>
    %42 = vector.extract_strided_slice %22 {offsets = [1, 0], sizes = [1, 4], strides = [1, 1]} : vector<4x128xf32> to vector<1x4xf32>
    %cst_12 = arith.constant dense<0.000000e+00> : vector<1x4xf32>
    %43 = tpu.matmul %0, %40, %cst_12 {dimension_numbers = #tpu.dot_dimension_numbers<[1], [0], [0], [1], [0, 0, 1, 1], [], []>} : vector<1x32xf32>, vector<32x4xf32>, vector<1x4xf32> -> vector<1x4xf32>
    %cst_13 = arith.constant 3.125000e-02 : f32
    %44 = vector.broadcast %cst_13 : f32 to vector<1x4xf32>
    %45 = arith.mulf %43, %44 : vector<1x4xf32>
    %46 = arith.mulf %40, %40 : vector<32x4xf32>
    %cst_14 = arith.constant dense<0.000000e+00> : vector<1x4xf32>
    %47 = tpu.matmul %0, %46, %cst_14 {dimension_numbers = #tpu.dot_dimension_numbers<[1], [0], [0], [1], [0, 0, 1, 1], [], []>} : vector<1x32xf32>, vector<32x4xf32>, vector<1x4xf32> -> vector<1x4xf32>
    %cst_15 = arith.constant 3.125000e-02 : f32
    %48 = vector.broadcast %cst_15 : f32 to vector<1x4xf32>
    %49 = arith.mulf %47, %48 : vector<1x4xf32>
    %50 = arith.mulf %45, %45 : vector<1x4xf32>
    %51 = arith.subf %49, %50 : vector<1x4xf32>
    %cst_16 = arith.constant 0.000000e+00 : f32
    %52 = vector.broadcast %cst_16 : f32 to vector<1x4xf32>
    %53 = arith.maximumf %51, %52 : vector<1x4xf32>
    %cst_17 = arith.constant 9.99999974E-6 : f32
    %54 = vector.broadcast %cst_17 : f32 to vector<1x4xf32>
    %55 = arith.addf %53, %54 : vector<1x4xf32>
    %56 = math.rsqrt %55 : vector<1x4xf32>
    %57 = arith.mulf %41, %56 : vector<1x4xf32>
    %58 = arith.mulf %45, %57 : vector<1x4xf32>
    %59 = arith.subf %42, %58 : vector<1x4xf32>
    %60 = vector.broadcast %57 : vector<1x4xf32> to vector<32x4xf32>
    %61 = arith.mulf %40, %60 : vector<32x4xf32>
    %62 = vector.broadcast %59 : vector<1x4xf32> to vector<32x4xf32>
    %63 = arith.addf %61, %62 : vector<32x4xf32>
    %cst_18 = arith.constant 0.000000e+00 : f32
    %64 = vector.broadcast %cst_18 : f32 to vector<32x4xf32>
    %65 = arith.maximumf %63, %64 : vector<32x4xf32>
    %66 = vector.extract_strided_slice %65 {offsets = [31, 0], sizes = [1, 4], strides = [1, 1]} : vector<32x4xf32> to vector<1x4xf32>
    %67 = vector.extract_strided_slice %65 {offsets = [0, 0], sizes = [31, 4], strides = [1, 1]} : vector<32x4xf32> to vector<31x4xf32>
    %68 = tpu.concatenate %66, %67 in 0 : vector<1x4xf32>, vector<31x4xf32> -> vector<32x4xf32>
    %cst_19 = arith.constant 0.000000e+00 : f32
    %69 = vector.shape_cast %19 : vector<32x1xi1> to vector<32x1xi1>
    %70 = vector.broadcast %69 : vector<32x1xi1> to vector<32x4xi1>
    %71 = vector.broadcast %cst_19 : f32 to vector<32x4xf32>
    %72 = arith.select %70, %71, %68 : vector<32x4xi1>, vector<32x4xf32>
    %73 = vector.extract_strided_slice %65 {offsets = [1, 0], sizes = [31, 4], strides = [1, 1]} : vector<32x4xf32> to vector<31x4xf32>
    %74 = vector.extract_strided_slice %65 {offsets = [0, 0], sizes = [1, 4], strides = [1, 1]} : vector<32x4xf32> to vector<1x4xf32>
    %75 = tpu.concatenate %73, %74 in 0 : vector<31x4xf32>, vector<1x4xf32> -> vector<32x4xf32>
    %cst_20 = arith.constant 0.000000e+00 : f32
    %76 = vector.shape_cast %21 : vector<32x1xi1> to vector<32x1xi1>
    %77 = vector.broadcast %76 : vector<32x1xi1> to vector<32x4xi1>
    %78 = vector.broadcast %cst_20 : f32 to vector<32x4xf32>
    %79 = arith.select %77, %78, %75 : vector<32x4xi1>, vector<32x4xf32>
    %80 = tpu.concatenate %72, %65, %79 in 1 : vector<32x4xf32>, vector<32x4xf32>, vector<32x4xf32> -> vector<32x12xf32>
    %c0_21 = arith.constant 0 : index
    %c0_22 = arith.constant 0 : index
    %81 = vector.load %arg2[%c0_21, %c0_22] : memref<12x128xf32, #tpu.memory_space<vmem>>, vector<12x128xf32>
    %cst_23 = arith.constant dense<0.000000e+00> : vector<32x128xf32>
    %82 = tpu.matmul %80, %81, %cst_23 {dimension_numbers = #tpu.dot_dimension_numbers<[1], [0], [0], [1], [0, 0, 1, 1], [], []>} : vector<32x12xf32>, vector<12x128xf32>, vector<32x128xf32> -> vector<32x128xf32>
    %83 = vector.extract_strided_slice %22 {offsets = [2, 0], sizes = [1, 128], strides = [1, 1]} : vector<4x128xf32> to vector<1x128xf32>
    %84 = vector.extract_strided_slice %22 {offsets = [3, 0], sizes = [1, 128], strides = [1, 1]} : vector<4x128xf32> to vector<1x128xf32>
    %cst_24 = arith.constant dense<0.000000e+00> : vector<1x128xf32>
    %85 = tpu.matmul %0, %82, %cst_24 {dimension_numbers = #tpu.dot_dimension_numbers<[1], [0], [0], [1], [0, 0, 1, 1], [], []>} : vector<1x32xf32>, vector<32x128xf32>, vector<1x128xf32> -> vector<1x128xf32>
    %cst_25 = arith.constant 3.125000e-02 : f32
    %86 = vector.broadcast %cst_25 : f32 to vector<1x128xf32>
    %87 = arith.mulf %85, %86 : vector<1x128xf32>
    %88 = arith.mulf %82, %82 : vector<32x128xf32>
    %cst_26 = arith.constant dense<0.000000e+00> : vector<1x128xf32>
    %89 = tpu.matmul %0, %88, %cst_26 {dimension_numbers = #tpu.dot_dimension_numbers<[1], [0], [0], [1], [0, 0, 1, 1], [], []>} : vector<1x32xf32>, vector<32x128xf32>, vector<1x128xf32> -> vector<1x128xf32>
    %cst_27 = arith.constant 3.125000e-02 : f32
    %90 = vector.broadcast %cst_27 : f32 to vector<1x128xf32>
    %91 = arith.mulf %89, %90 : vector<1x128xf32>
    %92 = arith.mulf %87, %87 : vector<1x128xf32>
    %93 = arith.subf %91, %92 : vector<1x128xf32>
    %cst_28 = arith.constant 0.000000e+00 : f32
    %94 = vector.broadcast %cst_28 : f32 to vector<1x128xf32>
    %95 = arith.maximumf %93, %94 : vector<1x128xf32>
    %cst_29 = arith.constant 9.99999974E-6 : f32
    %96 = vector.broadcast %cst_29 : f32 to vector<1x128xf32>
    %97 = arith.addf %95, %96 : vector<1x128xf32>
    %98 = math.rsqrt %97 : vector<1x128xf32>
    %99 = arith.mulf %83, %98 : vector<1x128xf32>
    %100 = arith.mulf %87, %99 : vector<1x128xf32>
    %101 = arith.subf %84, %100 : vector<1x128xf32>
    %102 = vector.broadcast %99 : vector<1x128xf32> to vector<32x128xf32>
    %103 = arith.mulf %82, %102 : vector<32x128xf32>
    %104 = vector.broadcast %101 : vector<1x128xf32> to vector<32x128xf32>
    %105 = arith.addf %103, %104 : vector<32x128xf32>
    %cst_30 = arith.constant 0.000000e+00 : f32
    %106 = vector.broadcast %cst_30 : f32 to vector<32x128xf32>
    %107 = arith.maximumf %105, %106 : vector<32x128xf32>
    %c0_31 = arith.constant 0 : index
    %c0_32 = arith.constant 0 : index
    %108 = vector.load %arg4[%c0_31, %c0_32] : memref<32x128xf32, #tpu.memory_space<vmem>>, vector<32x128xf32>
    tpu.vector_store %arg4[%c0_31, %c0_32], %107 {strides = array<i32>} : memref<32x128xf32, #tpu.memory_space<vmem>>, vector<32x128xf32>,
    return
  }
}

</mosaic_0001>

<bundles_post_ra>
// kernel: up_forward.1
= control target key start
LH: loop header
LB: loop body
LE: loop exit
PB: predicated region body
PF: predicated region fallthrough
CT: control target
= control target key end

     0   :  { %v17_v0 = vlaneseq  ;;  %vm89_vm0 = vcmask 1040384   ;;  %s951_s21 = smov 8   ;;  %vm113_vm1 = vcmask 1046528   ;;  %s952_s29 = smov 16   ;;  %vm167_vm5 = vcmask 64512   ;;  %s1148_s0 = inlined_call_operand.vmem [shape: f32[32,8], index: 0, kind: input, shape index: {}]   ;;  %s1149_s1 = inlined_call_operand.vmem [shape: f32[24,4], index: 1, kind: input, shape index: {}]   ;;  %s1150_s3 = inlined_call_operand.vmem [shape: f32[4,128], index: 3, kind: input, shape index: {}]   ;;  %s1151_s2 = inlined_call_operand.vmem [shape: f32[12,128], index: 2, kind: input, shape index: {}]   ;;  %s1152_s4 = inlined_call_operand.vmem [shape: f32[32,128], index: 4, kind: output, shape index: {}]  }
   0x1   :  { %v82_v1 = vld [vmem:[%s1148_s0 + $0x18] sm:$0xff]  ;;  %v79_v2 = vld [vmem:[%s1148_s0] sm:$0xff]  ;;  %v80_v3 = vld [vmem:[%s1148_s0 + $0x8] sm:$0xff]  ;;  %vm172_vm6 = vcmask 130048   ;;  %vm180_vm7 = vcmask 195584   ;;  %v953_v56 = vmov 0.0  }
   0x2   :  { %145 = vrot.lane.b32.xlu1 %v82_v1, %s951_s21  ;;  %v84_v4 = vrot.slane %v82_v1, 7  ;;  %139 = vrot.lane.b32.xlu0 %v79_v2, %s951_s21  ;;  %v90_v5 = vrot.slane %v79_v2, 7  ;;  %v114_v6 = vrot.slane %v79_v2, 1  ;;  %v81_v7 = vld [vmem:[%s1148_s0 + $0x10] sm:$0xff]  ;;  %v91_v9 = vrot.slane %v80_v3, 7  ;;  %v178_v12 = vld [vmem:[%s1149_s1 + $0x8] sm:$0xff] }
   0x3   :  { %v179_v8 = vld [vmem:[%s1149_s1 + $0x10] sm:$0xff]  ;;  %v115_v10 = vrot.slane %v80_v3, 1  ;;  %v93_v11 = vrot.slane %v81_v7, 7  ;;  %v117_v13 = vrot.slane %v81_v7, 1  ;;  %v1002_v14 = vshrl.u32 %v17_v0, 7  ;;  %v177_v18 = vld [vmem:[%s1149_s1] sm:$0xff]  ;;  %887 = vmatprep.subr.mxu1 %v953_v56 }
   0x4   :  { %875 = vmatprep.subr.mxu0 %v179_v8  ;;  %v100_v15 = vsel %vm89_vm0, %v84_v4, %v90_v5  ;;  %v119_v19 = vrot.slane %v82_v1, 1  ;;  %v92_v22 = vsel %vm89_vm0, %v90_v5, %v91_v9  ;;  %vm954_vm9 = vmmov 0   ;;  %s956_s8 = smov 4  }
   0x5   :  { %876 = vmatpush3.msra.mxu0 %v179_v8  ;;  %v116_v16 = vsel %vm113_vm1, %v114_v6, %v115_v10  ;;  %v95_v17 = vsel %vm89_vm0, %v93_v11, %v84_v4  ;;  %v19_v20 = vadd.s32 8, %v1002_v14  ;;  %v21_v21 = vadd.s32 24, %v1002_v14  ;;  %895 = vmatprep.mubr.msk.f32.mxu1 %vm954_vm9, %v953_v56 }
   0x6   :  { %877 = vmatprep.subr.mxu0 %v178_v12  ;;  %141 = vrot.lane.b32.xlu0 %v80_v3, %s951_s21  ;;  %v94_v23 = vsel %vm89_vm0, %v91_v9, %v93_v11  ;;  %v118_v25 = vsel %vm113_vm1, %v115_v10, %v117_v13  ;;  %v126_v29 = vsel %vm113_vm1, %v119_v19, %v114_v6  ;;  %v26_v33 = vand.u32 15, %v1002_v14 }
   0x7   :  { %155 = vrot.lane.b32.xlu1 %v116_v16, %s952_s29  ;;  %878 = vmatpush3.msra.mxu0 %v178_v12  ;;  %v33_v24 = vand.u32 15, %v19_v20  ;;  %v47_v26 = vand.u32 15, %v21_v21  ;;  %v120_v31 = vsel %vm113_vm1, %v117_v13, %v119_v19  ;;  %v20_v35 = vadd.s32 16, %v1002_v14  ;;  %v1079_v12 = vld [vmem:[%s1150_s3] sm:$0xf] }
   0x8   :  { %879 = vmatprep.subr.mxu0 %v177_v18  ;;  %vm1032_vm4 = vcmp.eq.s32.totalorder %v26_v33, 0  ;;  %vm278_vm10 = vcmask 261120   ;;  %v955_v1 = vmov 1.0   ;;  %v449_v20 = vsub.s32 1, %v1002_v14 }
   0x9   :  { %880 = vmatpush3.msra.mxu0 %v177_v18  ;;  %vm1017_vm2 = vcmp.eq.s32.totalorder %v33_v24, 15  ;;  %vm1021_vm3 = vcmp.eq.s32.totalorder %v47_v26, 15  ;;  %v109_v38 = vsel %vm1032_vm4, 0.0, %v100_v15  ;;  %v40_v39 = vand.u32 15, %v20_v35 }
   0xa   :  { %143 = vrot.lane.b32.xlu0 %v81_v7, %s951_s21  ;;  %v136_v30 = vsel %vm1017_vm2, 0.0, %v118_v25  ;;  %v138_v32 = vsel %vm1021_vm3, 0.0, %v126_v29  ;;  %898 = vmatprep.subr.mxu0 %v953_v56  ;;  %v441_v15 = vsub.s32 0, %v1002_v14  ;;  %vm549_vm11 = vcmask 1043456  }
   0xb   :  { %157 = vrot.lane.b32.xlu1 %v136_v30, %s952_s29  ;;  %vm1042_vm8 = vcmp.eq.s32.totalorder %v40_v39, 0  ;;  %v534_v30 = vld [vmem:[%s1151_s2] sm:$0xff]  ;;  %vm525_vm12 = vcmask 31744   ;;  %vm536_vm13 = vcmask 97280  }
   0xc   :  { %v111_v46 = vsel %vm1042_vm8, 0.0, %v94_v23 }
   0xe   :  { %159 = vrot.lane.b32.xlu0 %v120_v31, %s952_s29 }
   0xf   :  { %161 = vrot.lane.b32.xlu1 %v138_v32, %s952_s29 }
  0x74   :  { %v146_v36 = vpop.permute.xlu1 %145  ;;  %v140_v37 = vpop.permute.xlu0 %139 }
  0x75   :  { %v168_v40 = vsel %vm167_vm5, %v109_v38, %v140_v37  ;;  %v171_v53 = vsel %vm167_vm5, %v95_v17, %v146_v36 }
  0x78   :  { %v142_v41 = vpop.permute.xlu0 %141 }
  0x79   :  { %v156_v42 = vpop.permute.xlu1 %155  ;;  %v169_v47 = vsel %vm167_vm5, %v92_v22, %v142_v41  ;;  %v535_v22 = vld [vmem:[%s1151_s2 + $0x8] sm:$0xf] }
  0x7a   :  { %v173_v43 = vsel %vm172_vm6, %v168_v40, %v156_v42 }
  0x7b   :  { %881 = vmatprep.mubr.msk.f32.mxu0 %vm180_vm7, %v173_v43 }
  0x7c   :  { %v144_v45 = vpop.permute.xlu0 %143 }
  0x7d   :  { %v158_v48 = vpop.permute.xlu1 %157  ;;  %v170_v50 = vsel %vm167_vm5, %v111_v46, %v144_v45 }
  0x7e   :  { %v174_v49 = vsel %vm172_vm6, %v169_v47, %v158_v48 }
  0x7f   :  { %882 = vmatmul.mubr.msk.f32.vlgmr.msra.gmra.mxu0 %vm180_vm7, %v174_v49 }
  0x80   :  { %v160_v51 = vpop.permute.xlu0 %159 }
  0x81   :  { %v175_v52 = vsel %vm172_vm6, %v170_v50, %v160_v51  ;;  %v162_v54 = vpop.permute.xlu1 %161 }
  0x82   :  { %884 = vmatprep.mubr.msk.f32.mxu0 %vm180_vm7, %v175_v52  ;;  %v176_v55 = vsel %vm172_vm6, %v171_v53, %v162_v54 }
  0x83   :  { %885 = vmatmul.mubr.msk.f32.gmra.mxu0 %vm180_vm7, %v176_v55 }
  0x84   :  { %906 = vmatprep.mubr.msk.f32.mxu0 %vm954_vm9, %v953_v56 }
 0x13f   :  { %v883_v57 = vpop.f32.mrf.mxu0 }
 0x140   :  { %v354_v63 = vmul.f32 %v883_v57, %v883_v57 }
 0x141   :  { %v259_v58 = vpop.f32.mrf.mxu0 }
 0x142   :  { %v353_v0 = vmul.f32 %v259_v58, %v259_v58 }
 0x143   :  { %v886_v59 = vpop.f32.mrf.mxu0 }
 0x144   :  { %v356_v60 = vmul.f32 %v886_v59, %v886_v59  ;;  %888 = vmatpush3.msra.mxu1 %v886_v59 }
 0x145   :  { %v269_v61 = vpop.f32.mrf.mxu0  ;;  %889 = vmatprep.subr.mxu1 %v953_v56 }
 0x146   :  { %v355_v62 = vmul.f32 %v269_v61, %v269_v61  ;;  %890 = vmatpush3.msra.mxu1 %v269_v61  ;;  %899 = vmatpush3.msra.mxu0 %v356_v60 }
 0x147   :  { %891 = vmatprep.subr.mxu1 %v953_v56  ;;  %900 = vmatprep.subr.mxu0 %v953_v56 }
 0x148   :  { %892 = vmatpush3.msra.mxu1 %v883_v57  ;;  %901 = vmatpush3.msra.mxu0 %v355_v62 }
 0x149   :  { %893 = vmatprep.subr.mxu1 %v953_v56  ;;  %902 = vmatprep.subr.mxu0 %v953_v56 }
 0x14a   :  { %894 = vmatpush3.msra.mxu1 %v259_v58  ;;  %903 = vmatpush3.msra.mxu0 %v354_v63 }
 0x14b   :  { %896 = vmatmul.mubr.msk.f32.vlgmr.msra.gmra.mxu1 %vm278_vm10, %v955_v1  ;;  %904 = vmatprep.subr.mxu0 %v953_v56 }
 0x14c   :  { %905 = vmatpush3.msra.mxu0 %v353_v0  ;;  %909 = vmatprep.subr.msk.mxu1 %vm549_vm11, %v535_v22 }
 0x14d   :  { %907 = vmatmul.mubr.msk.f32.vlgmr.msra.gmra.mxu0 %vm278_vm10, %v955_v1  ;;  %930 = vmatprep.subr.mxu0 %v953_v56 }
 0x14e   :  { %938 = vmatprep.mubr.msk.f32.mxu0 %vm954_vm9, %v953_v56  ;;  %910 = vmatpush3.msk.msra.mxu1 %vm549_vm11, %v535_v22 }
 0x14f   :  { %911 = vmatprep.subr.mxu1 %v534_v30 }
 0x150   :  { %912 = vmatpush3.msra.mxu1 %v534_v30 }
 0x151   :  { %919 = vmatprep.subr.mxu1 %v953_v56 }
 0x20b   :  { %v348_v2 = vpop.f32.mrf.mxu1 }
 0x20c   :  { %v352_v3 = vmul.f32 0.03125, %v348_v2 }
 0x20d   :  { %v897_v4 = vpop.f32.mrf.mxu1  ;;  %v423_v5 = vpop.f32.mrf.mxu0 }
 0x20e   :  { %v428_v6 = vmul.f32 %v352_v3, %v352_v3  ;;  %v427_v7 = vmul.f32 0.03125, %v423_v5 }
 0x20f   :  { %v908_v8 = vpop.f32.mrf.mxu0 }
 0x210   :  { %v429_v9 = vsub.f32 %v427_v7, %v428_v6 }
 0x212   :  { %v430_v10 = vmax.f32 %v429_v9, 0.0 }
 0x214   :  { %v431_v11 = vadd.f32 1e-05, %v430_v10 }
 0x216   :  { %947 = vrsqrt.f32 %v431_v11 }
 0x223   :  { %v948_v13 = vpop.eup %947 }
 0x224   :  { %v433_v16 = vmul.f32 %v948_v13, %v1079_v12 }
 0x226   :  { %v434_v17 = vmul.f32 %v433_v16, %v352_v3  ;;  %v442_v18 = vrot.slane %v433_v16, %v441_v15 }
 0x228   :  { %v436_v19 = vrot.slane %v434_v17, 7  ;;  %v444_v23 = vmul.f32 %v883_v57, %v442_v18  ;;  %v443_v25 = vmul.f32 %v442_v18, %v259_v58  ;;  %v446_v26 = vmul.f32 %v886_v59, %v442_v18 }
 0x229   :  { %v445_v29 = vmul.f32 %v442_v18, %v269_v61 }
 0x22a   :  { %v438_v21 = vsub.f32 %v1079_v12, %v436_v19 }
 0x22c   :  { %v450_v24 = vrot.slane %v438_v21, %v449_v20 }
 0x22e   :  { %v452_v31 = vadd.f32 %v450_v24, %v444_v23  ;;  %v451_v32 = vadd.f32 %v450_v24, %v443_v25  ;;  %v454_v33 = vadd.f32 %v450_v24, %v446_v26  ;;  %v453_v35 = vadd.f32 %v450_v24, %v445_v29 }
 0x230   :  { %v456_v36 = vmax.f32 %v452_v31, 0.0  ;;  %v455_v37 = vmax.f32 %v451_v32, 0.0  ;;  %v458_v38 = vmax.f32 %v454_v33, 0.0  ;;  %v457_v39 = vmax.f32 %v453_v35, 0.0 }
 0x232   :  { %499 = vrot.lane.b32.xlu1 %v456_v36, %s956_s8  ;;  %497 = vrot.lane.b32.xlu0 %v455_v37, %s956_s8  ;;  %v460_v40 = vrot.slane %v458_v38, 7  ;;  %v481_v41 = vrot.slane %v456_v36, 1  ;;  %v483_v42 = vrot.slane %v457_v39, 1  ;;  %v465_v43 = vrot.slane %v455_v37, 7 }
 0x233   :  { %v466_v45 = vrot.slane %v456_v36, 7  ;;  %v468_v46 = vrot.slane %v457_v39, 7  ;;  %v480_v48 = vrot.slane %v455_v37, 1  ;;  %v485_v50 = vrot.slane %v458_v38, 1 }
 0x234   :  { %v484_v47 = vsel %vm113_vm1, %v481_v41, %v483_v42  ;;  %v475_v51 = vsel %vm89_vm0, %v460_v40, %v465_v43 }
 0x235   :  { %v467_v49 = vsel %vm89_vm0, %v465_v43, %v466_v45  ;;  %v470_v52 = vsel %vm89_vm0, %v468_v46, %v460_v40  ;;  %v469_v53 = vsel %vm89_vm0, %v466_v45, %v468_v46  ;;  %v494_v54 = vsel %vm1017_vm2, 0.0, %v484_v47 }
 0x236   :  { %503 = vrot.lane.b32.xlu1 %v458_v38, %s956_s8  ;;  %501 = vrot.lane.b32.xlu0 %v457_v39, %s956_s8  ;;  %v482_v55 = vsel %vm113_vm1, %v480_v48, %v481_v41  ;;  %v492_v57 = vsel %vm113_vm1, %v485_v50, %v480_v48  ;;  %v486_v59 = vsel %vm113_vm1, %v483_v42, %v485_v50  ;;  %v476_v63 = vsel %vm1032_vm4, 0.0, %v475_v51 }
 0x237   :  { %v496_v58 = vsel %vm1021_vm3, 0.0, %v492_v57  ;;  %v478_v6 = vsel %vm1042_vm8, 0.0, %v469_v53  ;;  %v811_v40 = vsub.s32 3, %v1002_v14 }
 0x23a   :  { %515 = vrot.lane.b32.xlu1 %v494_v54, %s951_s21  ;;  %513 = vrot.lane.b32.xlu0 %v482_v55, %s951_s21 }
 0x23e   :  { %519 = vrot.lane.b32.xlu1 %v496_v58, %s951_s21  ;;  %517 = vrot.lane.b32.xlu0 %v486_v59, %s951_s21 }
 0x2a4   :  { %v500_v60 = vpop.permute.xlu1 %499  ;;  %v498_v27 = vpop.permute.xlu0 %497 }
 0x2a5   :  { %v527_v0 = vsel %vm525_vm12, %v467_v49, %v500_v60  ;;  %v526_v2 = vsel %vm525_vm12, %v476_v63, %v498_v27 }
 0x2a8   :  { %v504_v61 = vpop.permute.xlu1 %503  ;;  %v502_v62 = vpop.permute.xlu0 %501 }
 0x2a9   :  { %v529_v7 = vsel %vm525_vm12, %v470_v52, %v504_v61  ;;  %v528_v8 = vsel %vm525_vm12, %v478_v6, %v502_v62 }
 0x2ac   :  { %v516_v3 = vpop.permute.xlu1 %515  ;;  %v514_v28 = vpop.permute.xlu0 %513 }
 0x2ad   :  { %v531_v4 = vsel %vm167_vm5, %v527_v0, %v516_v3  ;;  %v530_v5 = vsel %vm167_vm5, %v526_v2, %v514_v28 }
 0x2ae   :  { %913 = vmatprep.mubr.msk.f32.mxu1 %vm536_vm13, %v530_v5 }
 0x2af   :  { %914 = vmatmul.mubr.msk.f32.vlgmr.msra.gmra.mxu1 %vm536_vm13, %v531_v4 }
 0x2b0   :  { %v520_v34 = vpop.permute.xlu1 %519  ;;  %v518_v9 = vpop.permute.xlu0 %517 }
 0x2b1   :  { %v533_v10 = vsel %vm167_vm5, %v529_v7, %v520_v34  ;;  %v532_v11 = vsel %vm167_vm5, %v528_v8, %v518_v9 }
 0x2b2   :  { %916 = vmatprep.mubr.msk.f32.mxu1 %vm536_vm13, %v532_v11 }
 0x2b3   :  { %917 = vmatmul.mubr.msk.f32.gmra.mxu1 %vm536_vm13, %v533_v10 }
 0x2b4   :  { %927 = vmatprep.mubr.msk.f32.mxu1 %vm954_vm9, %v953_v56 }
 0x36f   :  { %v915_v13 = vpop.f32.mrf.mxu1 }
 0x370   :  { %v710_v19 = vmul.f32 %v915_v13, %v915_v13 }
 0x371   :  { %v619_v44 = vpop.f32.mrf.mxu1 }
 0x372   :  { %v709_v20 = vmul.f32 %v619_v44, %v619_v44 }
 0x373   :  { %v918_v15 = vpop.f32.mrf.mxu1 }
 0x374   :  { %v712_v16 = vmul.f32 %v918_v15, %v918_v15  ;;  %920 = vmatpush3.msra.mxu1 %v918_v15 }
 0x375   :  { %v629_v17 = vpop.f32.mrf.mxu1  ;;  %921 = vmatprep.subr.mxu1 %v953_v56 }
 0x376   :  { %v711_v18 = vmul.f32 %v629_v17, %v629_v17  ;;  %922 = vmatpush3.msra.mxu1 %v629_v17  ;;  %931 = vmatpush3.msra.mxu0 %v712_v16 }
 0x377   :  { %923 = vmatprep.subr.mxu1 %v953_v56  ;;  %932 = vmatprep.subr.mxu0 %v953_v56 }
 0x378   :  { %924 = vmatpush3.msra.mxu1 %v915_v13  ;;  %933 = vmatpush3.msra.mxu0 %v711_v18 }
 0x379   :  { %925 = vmatprep.subr.mxu1 %v953_v56  ;;  %934 = vmatprep.subr.mxu0 %v953_v56 }
 0x37a   :  { %926 = vmatpush3.msra.mxu1 %v619_v44  ;;  %935 = vmatpush3.msra.mxu0 %v710_v19 }
 0x37b   :  { %928 = vmatmul.mubr.msk.f32.vlgmr.msra.gmra.mxu1 %vm278_vm10, %v955_v1  ;;  %936 = vmatprep.subr.mxu0 %v953_v56  ;;  %v803_v56 = vsub.s32 2, %v1002_v14 }
 0x37c   :  { %937 = vmatpush3.msra.mxu0 %v709_v20 }
 0x37d   :  { %939 = vmatmul.mubr.msk.f32.vlgmr.msra.gmra.mxu0 %vm278_vm10, %v955_v1 }
 0x43b   :  { %v704_v21 = vpop.f32.mrf.mxu1 }
 0x43c   :  { %v708_v22 = vmul.f32 0.03125, %v704_v21 }
 0x43d   :  { %v929_v23 = vpop.f32.mrf.mxu1  ;;  %v779_v24 = vpop.f32.mrf.mxu0 }
 0x43e   :  { %v784_v25 = vmul.f32 %v708_v22, %v708_v22  ;;  %v783_v26 = vmul.f32 0.03125, %v779_v24 }
 0x43f   :  { %v940_v29 = vpop.f32.mrf.mxu0 }
 0x440   :  { %v785_v30 = vsub.f32 %v783_v26, %v784_v25 }
 0x442   :  { %v786_v31 = vmax.f32 %v785_v30, 0.0 }
 0x444   :  { %v787_v32 = vadd.f32 1e-05, %v786_v31 }
 0x446   :  { %949 = vrsqrt.f32 %v787_v32 }
 0x453   :  { %v950_v33 = vpop.eup %949 }
 0x454   :  { %v790_v35 = vrot.slane %v950_v33, 6 }
 0x456   :  { %v792_v36 = vmul.f32 %v790_v35, %v1079_v12 }
 0x458   :  { %v794_v37 = vrot.slane %v792_v36, 2  ;;  %v804_v1 = vrot.slane %v792_v36, %v803_v56 }
 0x45a   :  { %v796_v38 = vmul.f32 %v794_v37, %v708_v22  ;;  %v805_v42 = vmul.f32 %v804_v1, %v619_v44  ;;  %v806_v43 = vmul.f32 %v915_v13, %v804_v1  ;;  %v807_v45 = vmul.f32 %v804_v1, %v629_v17 }
 0x45b   :  { %v808_v46 = vmul.f32 %v918_v15, %v804_v1 }
 0x45c   :  { %v798_v39 = vrot.slane %v796_v38, 5 }
 0x45e   :  { %v800_v41 = vsub.f32 %v1079_v12, %v798_v39 }
 0x460   :  { %v812_v47 = vrot.slane %v800_v41, %v811_v40 }
 0x462   :  { %v813_v48 = vadd.f32 %v812_v47, %v805_v42  ;;  %v814_v49 = vadd.f32 %v812_v47, %v806_v43  ;;  %v815_v50 = vadd.f32 %v812_v47, %v807_v45  ;;  %v816_v51 = vadd.f32 %v812_v47, %v808_v46 }
 0x464   :  { %v817_v52 = vmax.f32 %v813_v48, 0.0  ;;  %v818_v53 = vmax.f32 %v814_v49, 0.0  ;;  %v819_v54 = vmax.f32 %v815_v50, 0.0  ;;  %v820_v55 = vmax.f32 %v816_v51, 0.0 }
 0x466   :  { %821 = vst [vmem:[%s1152_s4] sm:$0xff] %v817_v52  ;;  %822 = vst [vmem:[%s1152_s4 + $0x8] sm:$0xff] %v818_v53 }
 0x467   :  { %823 = vst [vmem:[%s1152_s4 + $0x10] sm:$0xff] %v819_v54  ;;  %824 = vst [vmem:[%s1152_s4 + $0x18] sm:$0xff] %v820_v55 }

</bundles_post_ra>
